<compile_context>
chip_gen: v7x
topology: tpu7x:2x2x1
jax: 0.10.0
libtpu: 0.0.40
codegen_flags: <defaults>
</compile_context>

<pallas_src>
import jax
import jax.numpy as jnp
from jax.experimental import pallas as pl
from jax.experimental.pallas import tpu as pltpu

_NEG = -1e30  # pad value for the class-padded bias columns


def logreg_kernel(x_ref, wt_ref, b_ref, y_ref, logits_ref, rowloss_ref):
    # ---- linear layer: logits = x @ W^T + b  (MXU, f32 accumulate) ----
    logits = (
        jnp.dot(x_ref[...], wt_ref[...], preferred_element_type=jnp.float32)
        + b_ref[...]
    )  # (tB, C_pad)
    logits_ref[...] = logits.astype(logits_ref.dtype)

    # ---- per-row cross entropy, numerically stable; everything stays in
    #      registers (no re-read of logits_ref after the store) ----
    tb, c_pad = logits.shape
    m = jnp.max(logits, axis=-1, keepdims=True)                         # (tB, 1)
    lse = m + jnp.log(jnp.sum(jnp.exp(logits - m), axis=-1, keepdims=True))
    lane = jax.lax.broadcasted_iota(jnp.int32, (tb, c_pad), 1)          # class ids
    picked = jnp.sum(
        jnp.where(lane == y_ref[...], logits, 0.0), axis=-1, keepdims=True
    )                                                                    # (tB, 1)
    rowloss_ref[...] = lse - picked


def _round_up(n, m):
    return (n + m - 1) // m * m


def logistic_regression_forward(x, y, weight, bias, *, block_b=None):
    """x: (B, D) f32, y: (B,) int, weight: (C, D) f32, bias: (C,) f32."""
    B, D = x.shape
    C = weight.shape[0]

    C_pad = _round_up(C, 128)                    # lane-dense class axis
    if block_b is None:
        # sized so 2x double-buffered (tB*D + tB*C_pad) f32 stays well under
        # v7x's 64 MiB VMEM / 32 MiB default scoped limit for moderate D
        block_b = min(1024, _round_up(B, 8))
    B_pad = _round_up(B, block_b)
    grid = (B_pad // block_b,)

    x_p = jnp.pad(x.astype(jnp.float32), ((0, B_pad - B), (0, 0)))
    y_p = jnp.pad(y.astype(jnp.int32), (0, B_pad - B)).reshape(B_pad, 1)
    wt_p = jnp.pad(weight.T.astype(jnp.float32), ((0, 0), (0, C_pad - C)))
    b_p = jnp.concatenate(
        [bias.astype(jnp.float32), jnp.full((C_pad - C,), _NEG, jnp.float32)]
    ).reshape(1, C_pad)

    logits_p, row_loss = pl.pallas_call(
        logreg_kernel,
        out_shape=(
            jax.ShapeDtypeStruct((B_pad, C_pad), jnp.float32),
            jax.ShapeDtypeStruct((B_pad, 1), jnp.float32),
        ),
        grid_spec=pltpu.PrefetchScalarGridSpec(
            num_scalar_prefetch=0,
            grid=grid,
            in_specs=[
                pl.BlockSpec((block_b, D), lambda i: (i, 0)),      # x batch tile
                pl.BlockSpec((D, C_pad), lambda i: (0, 0)),        # W^T resident
                pl.BlockSpec((1, C_pad), lambda i: (0, 0)),        # bias resident
                pl.BlockSpec((block_b, 1), lambda i: (i, 0)),      # labels tile
            ],
            out_specs=(
                pl.BlockSpec((block_b, C_pad), lambda i: (i, 0)),  # logits tile
                pl.BlockSpec((block_b, 1), lambda i: (i, 0)),      # per-row loss
            ),
        ),
        compiler_params=pltpu.CompilerParams(
            dimension_semantics=("parallel",),  # batch tiles shard across TCs (v7x)
        ),
    )(x_p, wt_p, b_p, y_p)

    logits = logits_p[:B, :C]
    loss = jnp.sum(row_loss[:B, 0]) / B          # mean over real rows only
    return logits, loss


if __name__ == "__main__":
    B, D, C = 8, 32, 10  # batch, num_dim, num_class

    key = jax.random.PRNGKey(0)
    kx, ky, kw = jax.random.split(key, 3)

    # Deterministic parameter init (xavier_uniform for weight, zeros for bias),
    # matching the shapes in the PyTorch __init__.
    bound = (6.0 / (D + C)) ** 0.5
    weight = jax.random.uniform(kw, (C, D), jnp.float32, -bound, bound)
    bias = jnp.zeros((C,), jnp.float32)

    x = jax.random.normal(kx, (B, D), jnp.float32)
    y = jax.random.randint(ky, (B,), 0, C, jnp.int32)

    logits, loss = logistic_regression_forward(x, y, weight, bias)
    jax.block_until_ready((logits, loss))

    # sanity check against plain-JAX reference
    ref_logits = x @ weight.T + bias
    ref_loss = jnp.mean(
        jax.nn.logsumexp(ref_logits, axis=-1)
        - jnp.take_along_axis(ref_logits, y[:, None], axis=-1)[:, 0]
    )
    assert jnp.allclose(logits, ref_logits, atol=1e-5), "logits mismatch"
    assert jnp.allclose(loss, ref_loss, atol=1e-5), "loss mismatch"

    print("KERNEL_OK")
</pallas_src>

<mosaic_0001>
module attributes {stable_mosaic.version = 11 : i64} {
  func.func @logreg_kernel(%arg0: i32, %arg1: memref<8x32xf32, #tpu.memory_space<vmem>>, %arg2: memref<32x128xf32, #tpu.memory_space<vmem>>, %arg3: memref<1x128xf32, #tpu.memory_space<vmem>>, %arg4: memref<8x1xi32, #tpu.memory_space<vmem>>, %arg5: memref<8x128xf32, #tpu.memory_space<vmem>>, %arg6: memref<8x1xf32, #tpu.memory_space<vmem>>) attributes {dimension_semantics = [#tpu.dimension_semantics<parallel>], iteration_bounds = array<i64: 1>, scalar_prefetch = 0 : i64, scratch_operands = 0 : i64, tpu.core_type = #tpu.core_type<tc>, window_params = [{transform_indices = @transform_0, window_bounds = array<i64: 8, 32>}, {pipeline_mode = #tpu.pipeline_mode<synchronous>, transform_indices = @transform_1, window_bounds = array<i64: 32, 128>}, {pipeline_mode = #tpu.pipeline_mode<synchronous>, transform_indices = @transform_2, window_bounds = array<i64: 1, 128>}, {transform_indices = @transform_3, window_bounds = array<i64: 8, 1>}, {transform_indices = @transform_4, window_bounds = array<i64: 8, 128>}, {transform_indices = @transform_5, window_bounds = array<i64: 8, 1>}]} {
    %c0 = arith.constant 0 : index
    %c0_0 = arith.constant 0 : index
    %0 = vector.load %arg1[%c0, %c0_0] : memref<8x32xf32, #tpu.memory_space<vmem>>, vector<8x32xf32>
    %c0_1 = arith.constant 0 : index
    %c0_2 = arith.constant 0 : index
    %1 = vector.load %arg2[%c0_1, %c0_2] : memref<32x128xf32, #tpu.memory_space<vmem>>, vector<32x128xf32>
    %cst = arith.constant dense<0.000000e+00> : vector<8x128xf32>
    %2 = tpu.matmul %0, %1, %cst {dimension_numbers = #tpu.dot_dimension_numbers<[1], [0], [0], [1], [0, 0, 1, 1], [], []>} : vector<8x32xf32>, vector<32x128xf32>, vector<8x128xf32> -> vector<8x128xf32>
    %c0_3 = arith.constant 0 : index
    %c0_4 = arith.constant 0 : index
    %3 = vector.load %arg3[%c0_3, %c0_4] : memref<1x128xf32, #tpu.memory_space<vmem>>, vector<1x128xf32>
    %4 = vector.broadcast %3 : vector<1x128xf32> to vector<8x128xf32>
    %5 = arith.addf %2, %4 : vector<8x128xf32>
    %c0_5 = arith.constant 0 : index
    %c0_6 = arith.constant 0 : index
    %6 = vector.load %arg5[%c0_5, %c0_6] : memref<8x128xf32, #tpu.memory_space<vmem>>, vector<8x128xf32>
    tpu.vector_store %arg5[%c0_5, %c0_6], %5 {strides = array<i32>} : memref<8x128xf32, #tpu.memory_space<vmem>>, vector<8x128xf32>,
    %cst_7 = arith.constant dense<0xFF800000> : vector<8xf32>
    %7 = vector.multi_reduction <maximumf>, %5, %cst_7 [1] : vector<8x128xf32> to vector<8xf32>
    %8 = vector.shape_cast %7 : vector<8xf32> to vector<8x1xf32>
    %9 = vector.broadcast %8 : vector<8x1xf32> to vector<8x128xf32>
    %10 = arith.subf %5, %9 : vector<8x128xf32>
    %11 = math.exp %10 : vector<8x128xf32>
    %cst_8 = arith.constant dense<0.000000e+00> : vector<8xf32>
    %12 = vector.multi_reduction <add>, %11, %cst_8 [1] : vector<8x128xf32> to vector<8xf32>
    %13 = vector.shape_cast %12 : vector<8xf32> to vector<8x1xf32>
    %14 = math.log %13 : vector<8x1xf32>
    %15 = arith.addf %8, %14 : vector<8x1xf32>
    %16 = tpu.iota {dimensions = array<i32: 1>} : vector<8x128xi32>
    %c0_9 = arith.constant 0 : index
    %c0_10 = arith.constant 0 : index
    %17 = vector.load %arg4[%c0_9, %c0_10] : memref<8x1xi32, #tpu.memory_space<vmem>>, vector<8x1xi32>
    %18 = vector.broadcast %17 : vector<8x1xi32> to vector<8x128xi32>
    %19 = arith.cmpi eq, %16, %18 : vector<8x128xi32>
    %cst_11 = arith.constant 0.000000e+00 : f32
    %20 = vector.broadcast %cst_11 : f32 to vector<8x128xf32>
    %21 = arith.select %19, %5, %20 : vector<8x128xi1>, vector<8x128xf32>
    %cst_12 = arith.constant dense<0.000000e+00> : vector<8xf32>
    %22 = vector.multi_reduction <add>, %21, %cst_12 [1] : vector<8x128xf32> to vector<8xf32>
    %23 = vector.shape_cast %22 : vector<8xf32> to vector<8x1xf32>
    %24 = arith.subf %15, %23 : vector<8x1xf32>
    %c0_13 = arith.constant 0 : index
    %c0_14 = arith.constant 0 : index
    %25 = vector.load %arg6[%c0_13, %c0_14] : memref<8x1xf32, #tpu.memory_space<vmem>>, vector<8x1xf32>
    tpu.vector_store %arg6[%c0_13, %c0_14], %24 {strides = array<i32>} : memref<8x1xf32, #tpu.memory_space<vmem>>, vector<8x1xf32>,
    return
  }
  func.func @transform_0(%arg0: i32) -> (i32, i32) {
    %c0_i32 = arith.constant 0 : i32
    %c0_i32_0 = arith.constant 0 : i32
    return %arg0, %c0_i32 : i32, i32
  }
  func.func @transform_1(%arg0: i32) -> (i32, i32) {
    %c0_i32 = arith.constant 0 : i32
    %c0_i32_0 = arith.constant 0 : i32
    %c0_i32_1 = arith.constant 0 : i32
    return %c0_i32, %c0_i32_0 : i32, i32
  }
  func.func @transform_2(%arg0: i32) -> (i32, i32) {
    %c0_i32 = arith.constant 0 : i32
    %c0_i32_0 = arith.constant 0 : i32
    %c0_i32_1 = arith.constant 0 : i32
    return %c0_i32, %c0_i32_0 : i32, i32
  }
  func.func @transform_3(%arg0: i32) -> (i32, i32) {
    %c0_i32 = arith.constant 0 : i32
    %c0_i32_0 = arith.constant 0 : i32
    return %arg0, %c0_i32 : i32, i32
  }
  func.func @transform_4(%arg0: i32) -> (i32, i32) {
    %c0_i32 = arith.constant 0 : i32
    %c0_i32_0 = arith.constant 0 : i32
    return %arg0, %c0_i32 : i32, i32
  }
  func.func @transform_5(%arg0: i32) -> (i32, i32) {
    %c0_i32 = arith.constant 0 : i32
    %c0_i32_0 = arith.constant 0 : i32
    return %arg0, %c0_i32 : i32, i32
  }
}

</mosaic_0001>

<bundles_post_ra>
// kernel: tpu_custom_call.1
= control target key start
LH: loop header
LB: loop body
LE: loop exit
PB: predicated region body
PF: predicated region fallthrough
CT: control target
= control target key end

     0   :  { %11 = vsyncpa [#allocation3], 0  ;;  %s322_s0 = inlined_call_operand.vmem [shape: f32[8,32], index: 0, kind: input, shape index: {}]   ;;  %s323_s1 = inlined_call_operand.hbm [shape: f32[32,128], index: 1, kind: input, shape index: {}]   ;;  %s324_s2 = inlined_call_operand.vmem [shape: f32[1,128], index: 2, kind: input, shape index: {}]   ;;  %s325_s3 = inlined_call_operand.vmem [shape: s32[8,1], index: 3, kind: input, shape index: {}]   ;;  %s326_s4 = inlined_call_operand.hbm [shape: f32[8,128], index: 4, kind: output, shape index: {0}]   ;;  %s327_s5 = inlined_call_operand.vmem [shape: f32[8,1], index: 5, kind: output, shape index: {1}]  }
   0x1   :  { %12 = vsyncpa [#allocation4], 0  ;;  %s248_s18 = smov [#allocation2]   ;;  %s200_s22 = scalar_lea.hbm %s323_s1, 512 }
   0x2   :  { %s20_s19 = sshll.u32 %s248_s18, 4  ;;  %p201_p0 = scmp.ne.s32.totalorder %s323_s1, %s200_s22  ;;  %s21_s19 = int_to_ptr.vmem [resolvable:$true] %s20_s19 }
   0x3   :  { %p204_p1 = scmp.lt.u32.totalorder %s200_s22, %s323_s1 }
   0x5   :  { %p206_p2 = pnand %p204_p1, %p201_p0 }
   0x7   :  { %209 = shalt.err (!%p206_p2)
}
   0x8   :  { %s210_s27 = scalar_lea.vmem %s21_s19, 512  ;;  %p215_p4 = scmp.lt.s32.totalorder %s21_s19, %s21_s19 }
   0x9   :  { %p211_p3 = scmp.ne.s32.totalorder %s21_s19, %s210_s27  ;;  %p216_p5 = scmp.lt.s32.totalorder %s210_s27, %s210_s27 }
   0xb   :  { %p217_p6 = por %p216_p5, %p215_p4 }
   0xd   :  { %p218_p7 = pnand %p217_p6, %p211_p3 }
   0xf   :  { %221 = shalt.err (!%p218_p7)
}
  0x10   :  { %s249_s28 = smov 128   ;;  %s250_s29 = smov 8  }
  0x11   :  { %26 = dma.hbm_to_vmem [thread:$0]  %s323_s1, 512, %s21_s19, [#allocation3], %s249_s28, %s249_s28, %s250_s29  }
  0x12   :  { %244 = dma.done.wait [#allocation3], 512  }
  0x13   :  { %245 = vsyncadd [#allocation3], 4294966784  ;;  %v251_v0 = vmov 0.0|0.0   ;;  %vm252_vm0 = vmmov 0   ;;  %v253_v1 = vmov 0.0   ;;  %v35_v2 = vld [vmem:[#allocation2] sm:$0xff]  ;;  %v131_v18 = vlaneseq }
  0x14   :  { %181 = vmatprep.subr.bf16.mxu0 %v251_v0  ;;  %178 = vmatprep.mubr.msk.f32.mxu0 %vm252_vm0, %v253_v1  ;;  %v36_v3 = vld [vmem:[#allocation2 + $0x8] sm:$0xff]  ;;  %v37_v4 = vld [vmem:[#allocation2 + $0x10] sm:$0xff]  ;;  %v38_v6 = vld [vmem:[#allocation2 + $0x18] sm:$0xff]  ;;  %vm46_vm1 = vcmask 261120   ;;  %v254_v9 = vmov 0  }
  0x15   :  { %v182_v5 = vpack.c.bf16 %v36_v3, %v35_v2  ;;  %v185_v7 = vpack.c.bf16 %v38_v6, %v37_v4  ;;  %v34_v8 = vld [vmem:[%s322_s0] sm:$0xff]  ;;  %195 = vset.pattern.permute.xlu0 %v254_v9  ;;  %v132_v19 = vand.u32 127, %v131_v18  ;;  %s255_s0 = smov [#allocation5]  }
  0x16   :  { %v163_v10 = vld [vmem:[%s324_s2] ss:$0 sm:$0xff]  ;;  %s150_s2 = sshll.u32 %s255_s0, 4  ;;  %s151_s2 = int_to_ptr.vmem [resolvable:$true] %s150_s2 }
  0x17   :  { %183 = vmatpush3.bf16.msra.mxu0 %v182_v5  ;;  %v133_v14 = vld [vmem:[%s325_s3] sm:$0xff]  ;;  %s222_s12 = scalar_lea.vmem %s151_s2, 128  ;;  %p227_p9 = scmp.lt.s32.totalorder %s151_s2, %s151_s2 }
  0x18   :  { %184 = vmatprep.subr.bf16.mxu0 %v251_v0  ;;  %p223_p8 = scmp.ne.s32.totalorder %s151_s2, %s222_s12  ;;  %p228_p10 = scmp.lt.s32.totalorder %s222_s12, %s222_s12 }
  0x1a   :  { %p229_p11 = por %p228_p10, %p227_p9 }
  0x1b   :  { %186 = vmatpush3.bf16.msra.mxu0 %v185_v7 }
  0x1c   :  { %p230_p12 = pnand %p229_p11, %p223_p8 }
  0x1e   :  { %179 = vmatmul.mubr.msk.f32.vlgmr.msra.gmra.mrb[0].mxu0 %vm46_vm1, %v34_v8 }
  0xf1   :  { %v116_v11 = vpop.f32.mrb[0].mxu0 }
  0xf2   :  { %v117_v12 = vadd.f32 %v163_v10, %v116_v11  ;;  %v180_v13 = vpop.f32.mrb[1].mxu0 }
  0xf4   :  { %120 = vst [vmem:[#allocation5] sm:$0xff] %v117_v12  ;;  %121 = vmax.xlane.f32.xlu0 %v117_v12 }
 0x10a   :  { %135 = vperm.xlu0 %195, %v133_v14  }
 0x181   :  { %v122_v15 = vpop.xlane.xlu0 %121 }
 0x182   :  { %v123_v16 = vsub.f32 %v117_v12, %v122_v15 }
 0x184   :  { %v124_v17 = vmul.f32 1.442695, %v123_v16 }
 0x186   :  { %196 = vpow2.f32 %v124_v17 }
 0x189   :  { %v136_v20 = vpop.permute.xlu0 %135 }
 0x18a   :  { %vm137_vm2 = vcmp.eq.s32.totalorder %v132_v19, %v136_v20 }
 0x18b   :  { %v138_v22 = vsel %vm137_vm2, %v117_v12, 0.0 }
 0x190   :  { %v197_v21 = vpop.eup %196 }
 0x191   :  { %126 = vadd.xlane.f32.xlu1 %v197_v21 }
 0x195   :  { %139 = vadd.xlane.f32.xlu1 %v138_v22 }
 0x196   :  { %233 = shalt.err (!%p230_p12)
}
 0x197   :  { %s234_s14 = scalar_lea.hbm %s326_s4, 128 }
 0x198   :  { %p235_p13 = scmp.ne.s32.totalorder %s326_s4, %s234_s14  ;;  %p238_p0 = scmp.lt.u32.totalorder %s234_s14, %s326_s4 }
 0x19a   :  { %p240_p1 = pnand %p238_p0, %p235_p13 }
 0x19c   :  { %243 = shalt.err (!%p240_p1)
}
 0x19d   :  { %153 = dma.vmem_to_hbm [thread:$0]  %s151_s2, 128, %s326_s4, [#allocation4]   ;;  %vm142_vm3 = vcmask 7168  }
 0x21e   :  { %v127_v23 = vpop.xlane.xlu1 %126 }
 0x21f   :  { %198 = vlog2.f32 %v127_v23 }
 0x222   :  { %v140_v27 = vpop.xlane.xlu1 %139 }
 0x229   :  { %v199_v24 = vpop.eup %198 }
 0x22a   :  { %v129_v25 = vmul.f32 0.6931472, %v199_v24 }
 0x22c   :  { %v130_v26 = vadd.f32 %v129_v25, %v122_v15 }
 0x22e   :  { %v141_v28 = vsub.f32 %v130_v26, %v140_v27 }
 0x230   :  { %143 = vst.msk [vmem:[%s327_s5] sm:$0xff] %vm142_vm3, %v141_v28 }
 0x231   :  { %246 = dma.done.wait [#allocation4], 128  }
 0x232   :  { %247 = vsyncadd [#allocation4], 4294967168 }
 0x233   :  { %161 = vsyncpa [#allocation3], 1 }
 0x234   :  { %162 = vsyncpa [#allocation4], 1 }

</bundles_post_ra>
